<compile_context>
chip_gen: v7x
topology: tpu7x:2x2x1
jax: 0.10.0
libtpu: 0.0.40
codegen_flags: <defaults>
</compile_context>

<pallas_src>
import jax
import jax.numpy as jnp
import numpy as np
from jax import lax
from jax.experimental import pallas as pl
from jax.experimental.pallas import tpu as pltpu


def _round_up(n, m):
    return (n + m - 1) // m * m


def _lstm_kernel(x_ref, w_ih_ref, b_ref, w_hh_ref, w_out_ref, b_out_ref,
                 y_ref, h_ref, c_ref):
    """Fused LSTM recurrence + output projection over one (batch, time) tile.

    x_ref      : (TS, TB, Ip)  input tile (streamed, double-buffered)
    w_ih_ref   : (Ip, 4H)      input weights     (whole array, VMEM resident)
    b_ref      : (1, 4H)       b_ih + b_hh       (VMEM resident)
    w_hh_ref   : (H, 4H)       recurrent weights, gates packed along lanes
    w_out_ref  : (H, Op)       output weights (O padded to a lane multiple)
    b_out_ref  : (1, Op)       output bias
    y_ref      : (TS, TB, Op)  streamed output tile
    h_ref/c_ref: (TB, H) f32   recurrent state carried across time tiles
    """
    # PyTorch default h0 = c0 = 0; re-init at the first time tile of every
    # batch tile (time is the innermost, sequential grid axis).
    @pl.when(pl.program_id(1) == 0)
    def _():
        h_ref[...] = jnp.zeros_like(h_ref)
        c_ref[...] = jnp.zeros_like(c_ref)

    ts, tb, o_p = y_ref.shape
    hsz = h_ref.shape[-1]

    # Hoist weight / bias loads and the bias broadcasts out of the time loop.
    w_ih = w_ih_ref[...]
    w_hh = w_hh_ref[...]
    w_out = w_out_ref[...]
    bias = jnp.broadcast_to(b_ref[...].astype(jnp.float32), (tb, 4 * hsz))
    bias_out = jnp.broadcast_to(b_out_ref[...].astype(jnp.float32), (tb, o_p))
    mm_dtype = w_hh.dtype

    def step(s, carry):
        h, c = carry
        x_s = x_ref[s]                                           # (TB, Ip)
        # Fused gate pre-activations, packed i|f|g|o along lanes: (TB, 4H).
        gates = (jnp.dot(x_s, w_ih, preferred_element_type=jnp.float32)
                 + jnp.dot(h.astype(mm_dtype), w_hh,
                           preferred_element_type=jnp.float32)
                 + bias)
        sig = jax.nn.sigmoid(gates)          # one EUP pass over the full vreg
        i_g = sig[:, 0 * hsz:1 * hsz]
        f_g = sig[:, 1 * hsz:2 * hsz]
        o_g = sig[:, 3 * hsz:4 * hsz]
        g_g = jnp.tanh(gates[:, 2 * hsz:3 * hsz])
        c_new = f_g * c + i_g * g_g
        h_new = o_g * jnp.tanh(c_new)
        # Fused output projection epilogue: y_t = tanh(h_t @ W_out + b_out).
        y_s = jnp.tanh(jnp.dot(h_new.astype(mm_dtype), w_out,
                               preferred_element_type=jnp.float32) + bias_out)
        y_ref[s] = y_s.astype(y_ref.dtype)
        return h_new, c_new

    h_fin, c_fin = lax.fori_loop(0, ts, step, (h_ref[...], c_ref[...]),
                                 unroll=min(8, ts))
    h_ref[...] = h_fin
    c_ref[...] = c_fin


def _derive_time_block(seq_len, tb, i_p, o_p, budget_bytes=6 << 20):
    """Largest time block whose streamed (double-buffered) tiles fit budget."""
    sub = _round_up(max(tb, 1), 8)
    per_step = 2 * 4 * sub * (_round_up(i_p, 128) + _round_up(o_p, 128))
    ts = max(1, budget_bytes // per_step)
    return int(min(ts, 256, seq_len))


def lstm_model_forward(x, params, *, time_block=None, batch_block=None,
                       compute_dtype=jnp.float32,
                       vmem_limit_bytes=32 * 1024 * 1024):
    """x: (batch, seq, input_size) -> (batch, seq, output_size)."""
    w_ih, w_hh, b, w_out, b_out = params          # w_ih:(I,4H)  w_hh:(H,4H)
    B, S, I = x.shape
    H = w_hh.shape[0]
    O = w_out.shape[1]

    # Batch tiling. Default batch_block=B -> single shard; on v7x pass
    # batch_block=B//2 (must be a multiple of 8) so each TensorCore runs an
    # independent shard of the recurrence ("parallel" leading grid axis).
    TB = B if batch_block is None else int(batch_block)
    B_pad = _round_up(B, TB)

    # Pad the input-projection contraction dim to a sublane multiple and the
    # output dim to a lane multiple (lane-dense epilogue matmul + stores).
    I_p = _round_up(max(I, 1), 8)
    O_p = _round_up(max(O, 1), 128)

    xs = jnp.transpose(x, (1, 0, 2)).astype(compute_dtype)        # (S, B, I)
    if B_pad != B or I_p != I:
        xs = jnp.pad(xs, ((0, 0), (0, B_pad - B), (0, I_p - I)))

    # Time blocking: biggest tile whose streamed buffers fit the VMEM budget.
    if time_block is None:
        time_block = _derive_time_block(S, TB, I_p, O_p)
    TS = max(1, min(int(time_block), S))
    S_pad = _round_up(S, TS)
    if S_pad != S:
        # Padded trailing steps compute garbage that never feeds back into
        # valid steps (forward recurrence) and is sliced off below.
        xs = jnp.pad(xs, ((0, S_pad - S), (0, 0), (0, 0)))

    w_ih_p = jnp.pad(w_ih, ((0, I_p - I), (0, 0))).astype(compute_dtype)
    w_hh_c = w_hh.astype(compute_dtype)
    w_out_p = jnp.pad(w_out, ((0, 0), (0, O_p - O))).astype(compute_dtype)
    b_f = b.astype(jnp.float32)                                    # (1, 4H)
    b_out_p = jnp.pad(b_out, ((0, 0), (0, O_p - O))).astype(jnp.float32)

    grid = (B_pad // TB, S_pad // TS)

    y = pl.pallas_call(
        _lstm_kernel,
        out_shape=jax.ShapeDtypeStruct((S_pad, B_pad, O_p), jnp.float32),
        grid_spec=pltpu.PrefetchScalarGridSpec(
            num_scalar_prefetch=0,
            grid=grid,
            in_specs=[
                # Streamed input tile.
                pl.BlockSpec((TS, TB, I_p), lambda bb, t: (t, bb, 0)),
                # Grid-invariant operands: whole-array, single-buffered VMEM.
                pl.BlockSpec(memory_space=pltpu.MemorySpace.VMEM),   # W_ih
                pl.BlockSpec(memory_space=pltpu.MemorySpace.VMEM),   # b
                pl.BlockSpec(memory_space=pltpu.MemorySpace.VMEM),   # W_hh
                pl.BlockSpec(memory_space=pltpu.MemorySpace.VMEM),   # W_out
                pl.BlockSpec(memory_space=pltpu.MemorySpace.VMEM),   # b_out
            ],
            out_specs=pl.BlockSpec((TS, TB, O_p), lambda bb, t: (t, bb, 0)),
            scratch_shapes=[
                pltpu.VMEM((TB, H), jnp.float32),   # h state (carried)
                pltpu.VMEM((TB, H), jnp.float32),   # c state (carried)
            ],
        ),
        compiler_params=pltpu.CompilerParams(
            dimension_semantics=("parallel", "arbitrary"),
            vmem_limit_bytes=vmem_limit_bytes),
    )(xs, w_ih_p, b_f, w_hh_c, w_out_p, b_out_p)

    y = y[:S, :B, :O]                                              # (S, B, O)
    return jnp.transpose(y, (1, 0, 2)).astype(x.dtype)


def init_params(key, input_size=1, hidden_size=32, output_size=1):
    """Deterministic init mimicking PyTorch U(-1/sqrt(H), 1/sqrt(H))."""
    k = 1.0 / np.sqrt(hidden_size)
    ks = jax.random.split(key, 7)
    # Stored pre-transposed so forward does x @ W directly (gate order i|f|g|o).
    w_ih = jax.random.uniform(ks[0], (input_size, 4 * hidden_size),
                              jnp.float32, -k, k)
    w_hh = jax.random.uniform(ks[1], (hidden_size, 4 * hidden_size),
                              jnp.float32, -k, k)
    b_ih = jax.random.uniform(ks[2], (1, 4 * hidden_size), jnp.float32, -k, k)
    b_hh = jax.random.uniform(ks[3], (1, 4 * hidden_size), jnp.float32, -k, k)
    w_out = jax.random.uniform(ks[4], (hidden_size, output_size),
                               jnp.float32, -k, k)
    b_out = jax.random.uniform(ks[5], (1, output_size), jnp.float32, -k, k)
    return (w_ih, w_hh, b_ih + b_hh, w_out, b_out)


def reference_forward(x, params):
    """Pure-JAX reference (lax.scan) of the same forward pass."""
    w_ih, w_hh, b, w_out, b_out = params
    H = w_hh.shape[0]
    xs = jnp.transpose(x, (1, 0, 2)).astype(jnp.float32)
    B = xs.shape[1]

    def step(carry, x_t):
        h, c = carry
        gates = x_t @ w_ih + h @ w_hh + b
        i = jax.nn.sigmoid(gates[:, 0 * H:1 * H])
        f = jax.nn.sigmoid(gates[:, 1 * H:2 * H])
        g = jnp.tanh(gates[:, 2 * H:3 * H])
        o = jax.nn.sigmoid(gates[:, 3 * H:4 * H])
        c = f * c + i * g
        h = o * jnp.tanh(c)
        y = jnp.tanh(h @ w_out + b_out)
        return (h, c), y

    init = (jnp.zeros((B, H), jnp.float32), jnp.zeros((B, H), jnp.float32))
    _, ys = jax.lax.scan(step, init, xs)
    return jnp.transpose(ys, (1, 0, 2)).astype(x.dtype)


if __name__ == "__main__":
    key = jax.random.PRNGKey(0)
    k_param, k_x = jax.random.split(key)

    batch, seq, input_size, hidden_size, output_size = 2, 8, 1, 32, 1
    params = init_params(k_param, input_size, hidden_size, output_size)
    x = jax.random.normal(k_x, (batch, seq, input_size), jnp.float32)

    fwd = jax.jit(lstm_model_forward)
    out = fwd(x, params)
    out = jax.block_until_ready(out)

    ref = reference_forward(x, params)
    np.testing.assert_allclose(np.asarray(out), np.asarray(ref),
                               atol=1e-5, rtol=1e-5)
    assert out.shape == (batch, seq, output_size)
    print("KERNEL_OK")
</pallas_src>

<mosaic_0001>
module attributes {stable_mosaic.version = 11 : i64} {
  func.func @_lstm_kernel(%arg0: i32, %arg1: i32, %arg2: memref<8x2x8xf32, #tpu.memory_space<vmem>>, %arg3: memref<8x128xf32, #tpu.memory_space<vmem>>, %arg4: memref<1x128xf32, #tpu.memory_space<vmem>>, %arg5: memref<32x128xf32, #tpu.memory_space<vmem>>, %arg6: memref<32x128xf32, #tpu.memory_space<vmem>>, %arg7: memref<1x128xf32, #tpu.memory_space<vmem>>, %arg8: memref<8x2x128xf32, #tpu.memory_space<vmem>>, %arg9: memref<2x32xf32, #tpu.memory_space<vmem>>, %arg10: memref<2x32xf32, #tpu.memory_space<vmem>>) attributes {dimension_semantics = [#tpu.dimension_semantics<parallel>, #tpu.dimension_semantics<arbitrary>], iteration_bounds = array<i64: 1, 1>, scalar_prefetch = 0 : i64, scratch_operands = 2 : i64, tpu.core_type = #tpu.core_type<tc>, window_params = [{transform_indices = @transform_0, window_bounds = array<i64: 8, 2, 8>}, {pipeline_mode = #tpu.pipeline_mode<synchronous>, transform_indices = @transform_1, window_bounds = array<i64: 8, 128>}, {pipeline_mode = #tpu.pipeline_mode<synchronous>, transform_indices = @transform_2, window_bounds = array<i64: 1, 128>}, {pipeline_mode = #tpu.pipeline_mode<synchronous>, transform_indices = @transform_3, window_bounds = array<i64: 32, 128>}, {pipeline_mode = #tpu.pipeline_mode<synchronous>, transform_indices = @transform_4, window_bounds = array<i64: 32, 128>}, {pipeline_mode = #tpu.pipeline_mode<synchronous>, transform_indices = @transform_5, window_bounds = array<i64: 1, 128>}, {transform_indices = @transform_6, window_bounds = array<i64: 8, 2, 128>}]} {
    %c0_i32 = arith.constant 0 : i32
    %0 = arith.cmpi eq, %arg1, %c0_i32 : i32
    %1 = arith.extui %0 : i1 to i32
    %c0_i32_0 = arith.constant 0 : i32
    %2 = arith.cmpi ne, %1, %c0_i32_0 : i32
    scf.if %2 {
      %cst_82 = arith.constant 0.000000e+00 : f32
      %248 = vector.broadcast %cst_82 : f32 to vector<2x32xf32>
      %c0_83 = arith.constant 0 : index
      %c0_84 = arith.constant 0 : index
      %249 = vector.load %arg9[%c0_83, %c0_84] : memref<2x32xf32, #tpu.memory_space<vmem>>, vector<2x32xf32>
      tpu.vector_store %arg9[%c0_83, %c0_84], %248 {strides = array<i32>} : memref<2x32xf32, #tpu.memory_space<vmem>>, vector<2x32xf32>,
      %cst_85 = arith.constant 0.000000e+00 : f32
      %250 = vector.broadcast %cst_85 : f32 to vector<2x32xf32>
      %c0_86 = arith.constant 0 : index
      %c0_87 = arith.constant 0 : index
      %251 = vector.load %arg10[%c0_86, %c0_87] : memref<2x32xf32, #tpu.memory_space<vmem>>, vector<2x32xf32>
      tpu.vector_store %arg10[%c0_86, %c0_87], %250 {strides = array<i32>} : memref<2x32xf32, #tpu.memory_space<vmem>>, vector<2x32xf32>,
    } else {
    }
    %c0 = arith.constant 0 : index
    %c0_1 = arith.constant 0 : index
    %3 = vector.load %arg3[%c0, %c0_1] : memref<8x128xf32, #tpu.memory_space<vmem>>, vector<8x128xf32>
    %c0_2 = arith.constant 0 : index
    %c0_3 = arith.constant 0 : index
    %4 = vector.load %arg5[%c0_2, %c0_3] : memref<32x128xf32, #tpu.memory_space<vmem>>, vector<32x128xf32>
    %c0_4 = arith.constant 0 : index
    %c0_5 = arith.constant 0 : index
    %5 = vector.load %arg6[%c0_4, %c0_5] : memref<32x128xf32, #tpu.memory_space<vmem>>, vector<32x128xf32>
    %c0_6 = arith.constant 0 : index
    %c0_7 = arith.constant 0 : index
    %6 = vector.load %arg4[%c0_6, %c0_7] : memref<1x128xf32, #tpu.memory_space<vmem>>, vector<1x128xf32>
    %7 = vector.shape_cast %6 : vector<1x128xf32> to vector<1x128xf32>
    %8 = vector.broadcast %7 : vector<1x128xf32> to vector<2x128xf32>
    %c0_8 = arith.constant 0 : index
    %c0_9 = arith.constant 0 : index
    %9 = vector.load %arg7[%c0_8, %c0_9] : memref<1x128xf32, #tpu.memory_space<vmem>>, vector<1x128xf32>
    %10 = vector.shape_cast %9 : vector<1x128xf32> to vector<1x128xf32>
    %11 = vector.broadcast %10 : vector<1x128xf32> to vector<2x128xf32>
    %c0_10 = arith.constant 0 : index
    %c0_11 = arith.constant 0 : index
    %12 = vector.load %arg9[%c0_10, %c0_11] : memref<2x32xf32, #tpu.memory_space<vmem>>, vector<2x32xf32>
    %c0_12 = arith.constant 0 : index
    %c0_13 = arith.constant 0 : index
    %13 = vector.load %arg10[%c0_12, %c0_13] : memref<2x32xf32, #tpu.memory_space<vmem>>, vector<2x32xf32>
    %c0_i32_14 = arith.constant 0 : i32
    %14 = arith.index_cast %c0_i32_14 : i32 to index
    %c0_15 = arith.constant 0 : index
    %c0_16 = arith.constant 0 : index
    %15 = vector.load %arg2[%14, %c0_15, %c0_16] : memref<8x2x8xf32, #tpu.memory_space<vmem>>, vector<1x2x8xf32>
    %16 = vector.shape_cast %15 : vector<1x2x8xf32> to vector<2x8xf32>
    %cst = arith.constant dense<0.000000e+00> : vector<2x128xf32>
    %17 = tpu.matmul %16, %3, %cst {dimension_numbers = #tpu.dot_dimension_numbers<[1], [0], [0], [1], [0, 0, 1, 1], [], []>} : vector<2x8xf32>, vector<8x128xf32>, vector<2x128xf32> -> vector<2x128xf32>
    %cst_17 = arith.constant dense<0.000000e+00> : vector<2x128xf32>
    %18 = tpu.matmul %12, %4, %cst_17 {dimension_numbers = #tpu.dot_dimension_numbers<[1], [0], [0], [1], [0, 0, 1, 1], [], []>} : vector<2x32xf32>, vector<32x128xf32>, vector<2x128xf32> -> vector<2x128xf32>
    %19 = arith.addf %17, %18 : vector<2x128xf32>
    %20 = arith.addf %19, %8 : vector<2x128xf32>
    %21 = arith.negf %20 : vector<2x128xf32>
    %22 = math.exp %21 : vector<2x128xf32>
    %cst_18 = arith.constant 1.000000e+00 : f32
    %23 = vector.broadcast %cst_18 : f32 to vector<2x128xf32>
    %24 = arith.addf %23, %22 : vector<2x128xf32>
    %25 = arith.divf %23, %24 : vector<2x128xf32>
    %26 = vector.extract_strided_slice %25 {offsets = [0, 0], sizes = [2, 32], strides = [1, 1]} : vector<2x128xf32> to vector<2x32xf32>
    %27 = vector.extract_strided_slice %25 {offsets = [0, 32], sizes = [2, 32], strides = [1, 1]} : vector<2x128xf32> to vector<2x32xf32>
    %28 = vector.extract_strided_slice %25 {offsets = [0, 96], sizes = [2, 32], strides = [1, 1]} : vector<2x128xf32> to vector<2x32xf32>
    %29 = vector.extract_strided_slice %20 {offsets = [0, 64], sizes = [2, 32], strides = [1, 1]} : vector<2x128xf32> to vector<2x32xf32>
    %30 = math.tanh %29 : vector<2x32xf32>
    %31 = arith.mulf %27, %13 : vector<2x32xf32>
    %32 = arith.mulf %26, %30 : vector<2x32xf32>
    %33 = arith.addf %31, %32 : vector<2x32xf32>
    %34 = math.tanh %33 : vector<2x32xf32>
    %35 = arith.mulf %28, %34 : vector<2x32xf32>
    %cst_19 = arith.constant dense<0.000000e+00> : vector<2x128xf32>
    %36 = tpu.matmul %35, %5, %cst_19 {dimension_numbers = #tpu.dot_dimension_numbers<[1], [0], [0], [1], [0, 0, 1, 1], [], []>} : vector<2x32xf32>, vector<32x128xf32>, vector<2x128xf32> -> vector<2x128xf32>
    %37 = arith.addf %36, %11 : vector<2x128xf32>
    %38 = math.tanh %37 : vector<2x128xf32>
    %39 = arith.index_cast %c0_i32_14 : i32 to index
    %c0_20 = arith.constant 0 : index
    %c0_21 = arith.constant 0 : index
    %40 = vector.load %arg8[%39, %c0_20, %c0_21] : memref<8x2x128xf32, #tpu.memory_space<vmem>>, vector<1x2x128xf32>
    %41 = vector.shape_cast %40 : vector<1x2x128xf32> to vector<2x128xf32>
    %42 = vector.shape_cast %38 : vector<2x128xf32> to vector<1x2x128xf32>
    tpu.vector_store %arg8[%39, %c0_20, %c0_21], %42 {strides = array<i32>} : memref<8x2x128xf32, #tpu.memory_space<vmem>>, vector<1x2x128xf32>,
    %c1_i32 = arith.constant 1 : i32
    %43 = arith.index_cast %c1_i32 : i32 to index
    %c0_22 = arith.constant 0 : index
    %c0_23 = arith.constant 0 : index
    %44 = vector.load %arg2[%43, %c0_22, %c0_23] : memref<8x2x8xf32, #tpu.memory_space<vmem>>, vector<1x2x8xf32>
    %45 = vector.shape_cast %44 : vector<1x2x8xf32> to vector<2x8xf32>
    %cst_24 = arith.constant dense<0.000000e+00> : vector<2x128xf32>
    %46 = tpu.matmul %45, %3, %cst_24 {dimension_numbers = #tpu.dot_dimension_numbers<[1], [0], [0], [1], [0, 0, 1, 1], [], []>} : vector<2x8xf32>, vector<8x128xf32>, vector<2x128xf32> -> vector<2x128xf32>
    %cst_25 = arith.constant dense<0.000000e+00> : vector<2x128xf32>
    %47 = tpu.matmul %35, %4, %cst_25 {dimension_numbers = #tpu.dot_dimension_numbers<[1], [0], [0], [1], [0, 0, 1, 1], [], []>} : vector<2x32xf32>, vector<32x128xf32>, vector<2x128xf32> -> vector<2x128xf32>
    %48 = arith.addf %46, %47 : vector<2x128xf32>
    %49 = arith.addf %48, %8 : vector<2x128xf32>
    %50 = arith.negf %49 : vector<2x128xf32>
    %51 = math.exp %50 : vector<2x128xf32>
    %cst_26 = arith.constant 1.000000e+00 : f32
    %52 = vector.broadcast %cst_26 : f32 to vector<2x128xf32>
    %53 = arith.addf %52, %51 : vector<2x128xf32>
    %54 = arith.divf %52, %53 : vector<2x128xf32>
    %55 = vector.extract_strided_slice %54 {offsets = [0, 0], sizes = [2, 32], strides = [1, 1]} : vector<2x128xf32> to vector<2x32xf32>
    %56 = vector.extract_strided_slice %54 {offsets = [0, 32], sizes = [2, 32], strides = [1, 1]} : vector<2x128xf32> to vector<2x32xf32>
    %57 = vector.extract_strided_slice %54 {offsets = [0, 96], sizes = [2, 32], strides = [1, 1]} : vector<2x128xf32> to vector<2x32xf32>
    %58 = vector.extract_strided_slice %49 {offsets = [0, 64], sizes = [2, 32], strides = [1, 1]} : vector<2x128xf32> to vector<2x32xf32>
    %59 = math.tanh %58 : vector<2x32xf32>
    %60 = arith.mulf %56, %33 : vector<2x32xf32>
    %61 = arith.mulf %55, %59 : vector<2x32xf32>
    %62 = arith.addf %60, %61 : vector<2x32xf32>
    %63 = math.tanh %62 : vector<2x32xf32>
    %64 = arith.mulf %57, %63 : vector<2x32xf32>
    %cst_27 = arith.constant dense<0.000000e+00> : vector<2x128xf32>
    %65 = tpu.matmul %64, %5, %cst_27 {dimension_numbers = #tpu.dot_dimension_numbers<[1], [0], [0], [1], [0, 0, 1, 1], [], []>} : vector<2x32xf32>, vector<32x128xf32>, vector<2x128xf32> -> vector<2x128xf32>
    %66 = arith.addf %65, %11 : vector<2x128xf32>
    %67 = math.tanh %66 : vector<2x128xf32>
    %68 = arith.index_cast %c1_i32 : i32 to index
    %c0_28 = arith.constant 0 : index
    %c0_29 = arith.constant 0 : index
    %69 = vector.load %arg8[%68, %c0_28, %c0_29] : memref<8x2x128xf32, #tpu.memory_space<vmem>>, vector<1x2x128xf32>
    %70 = vector.shape_cast %69 : vector<1x2x128xf32> to vector<2x128xf32>
    %71 = vector.shape_cast %67 : vector<2x128xf32> to vector<1x2x128xf32>
    tpu.vector_store %arg8[%68, %c0_28, %c0_29], %71 {strides = array<i32>} : memref<8x2x128xf32, #tpu.memory_space<vmem>>, vector<1x2x128xf32>,
    %c2_i32 = arith.constant 2 : i32
    %72 = arith.index_cast %c2_i32 : i32 to index
    %c0_30 = arith.constant 0 : index
    %c0_31 = arith.constant 0 : index
    %73 = vector.load %arg2[%72, %c0_30, %c0_31] : memref<8x2x8xf32, #tpu.memory_space<vmem>>, vector<1x2x8xf32>
    %74 = vector.shape_cast %73 : vector<1x2x8xf32> to vector<2x8xf32>
    %cst_32 = arith.constant dense<0.000000e+00> : vector<2x128xf32>
    %75 = tpu.matmul %74, %3, %cst_32 {dimension_numbers = #tpu.dot_dimension_numbers<[1], [0], [0], [1], [0, 0, 1, 1], [], []>} : vector<2x8xf32>, vector<8x128xf32>, vector<2x128xf32> -> vector<2x128xf32>
    %cst_33 = arith.constant dense<0.000000e+00> : vector<2x128xf32>
    %76 = tpu.matmul %64, %4, %cst_33 {dimension_numbers = #tpu.dot_dimension_numbers<[1], [0], [0], [1], [0, 0, 1, 1], [], []>} : vector<2x32xf32>, vector<32x128xf32>, vector<2x128xf32> -> vector<2x128xf32>
    %77 = arith.addf %75, %76 : vector<2x128xf32>
    %78 = arith.addf %77, %8 : vector<2x128xf32>
    %79 = arith.negf %78 : vector<2x128xf32>
    %80 = math.exp %79 : vector<2x128xf32>
    %cst_34 = arith.constant 1.000000e+00 : f32
    %81 = vector.broadcast %cst_34 : f32 to vector<2x128xf32>
    %82 = arith.addf %81, %80 : vector<2x128xf32>
    %83 = arith.divf %81, %82 : vector<2x128xf32>
    %84 = vector.extract_strided_slice %83 {offsets = [0, 0], sizes = [2, 32], strides = [1, 1]} : vector<2x128xf32> to vector<2x32xf32>
    %85 = vector.extract_strided_slice %83 {offsets = [0, 32], sizes = [2, 32], strides = [1, 1]} : vector<2x128xf32> to vector<2x32xf32>
    %86 = vector.extract_strided_slice %83 {offsets = [0, 96], sizes = [2, 32], strides = [1, 1]} : vector<2x128xf32> to vector<2x32xf32>
    %87 = vector.extract_strided_slice %78 {offsets = [0, 64], sizes = [2, 32], strides = [1, 1]} : vector<2x128xf32> to vector<2x32xf32>
    %88 = math.tanh %87 : vector<2x32xf32>
    %89 = arith.mulf %85, %62 : vector<2x32xf32>
    %90 = arith.mulf %84, %88 : vector<2x32xf32>
    %91 = arith.addf %89, %90 : vector<2x32xf32>
    %92 = math.tanh %91 : vector<2x32xf32>
    %93 = arith.mulf %86, %92 : vector<2x32xf32>
    %cst_35 = arith.constant dense<0.000000e+00> : vector<2x128xf32>
    %94 = tpu.matmul %93, %5, %cst_35 {dimension_numbers = #tpu.dot_dimension_numbers<[1], [0], [0], [1], [0, 0, 1, 1], [], []>} : vector<2x32xf32>, vector<32x128xf32>, vector<2x128xf32> -> vector<2x128xf32>
    %95 = arith.addf %94, %11 : vector<2x128xf32>
    %96 = math.tanh %95 : vector<2x128xf32>
    %97 = arith.index_cast %c2_i32 : i32 to index
    %c0_36 = arith.constant 0 : index
    %c0_37 = arith.constant 0 : index
    %98 = vector.load %arg8[%97, %c0_36, %c0_37] : memref<8x2x128xf32, #tpu.memory_space<vmem>>, vector<1x2x128xf32>
    %99 = vector.shape_cast %98 : vector<1x2x128xf32> to vector<2x128xf32>
    %100 = vector.shape_cast %96 : vector<2x128xf32> to vector<1x2x128xf32>
    tpu.vector_store %arg8[%97, %c0_36, %c0_37], %100 {strides = array<i32>} : memref<8x2x128xf32, #tpu.memory_space<vmem>>, vector<1x2x128xf32>,
    %c3_i32 = arith.constant 3 : i32
    %101 = arith.index_cast %c3_i32 : i32 to index
    %c0_38 = arith.constant 0 : index
    %c0_39 = arith.constant 0 : index
    %102 = vector.load %arg2[%101, %c0_38, %c0_39] : memref<8x2x8xf32, #tpu.memory_space<vmem>>, vector<1x2x8xf32>
    %103 = vector.shape_cast %102 : vector<1x2x8xf32> to vector<2x8xf32>
    %cst_40 = arith.constant dense<0.000000e+00> : vector<2x128xf32>
    %104 = tpu.matmul %103, %3, %cst_40 {dimension_numbers = #tpu.dot_dimension_numbers<[1], [0], [0], [1], [0, 0, 1, 1], [], []>} : vector<2x8xf32>, vector<8x128xf32>, vector<2x128xf32> -> vector<2x128xf32>
    %cst_41 = arith.constant dense<0.000000e+00> : vector<2x128xf32>
    %105 = tpu.matmul %93, %4, %cst_41 {dimension_numbers = #tpu.dot_dimension_numbers<[1], [0], [0], [1], [0, 0, 1, 1], [], []>} : vector<2x32xf32>, vector<32x128xf32>, vector<2x128xf32> -> vector<2x128xf32>
    %106 = arith.addf %104, %105 : vector<2x128xf32>
    %107 = arith.addf %106, %8 : vector<2x128xf32>
    %108 = arith.negf %107 : vector<2x128xf32>
    %109 = math.exp %108 : vector<2x128xf32>
    %cst_42 = arith.constant 1.000000e+00 : f32
    %110 = vector.broadcast %cst_42 : f32 to vector<2x128xf32>
    %111 = arith.addf %110, %109 : vector<2x128xf32>
    %112 = arith.divf %110, %111 : vector<2x128xf32>
    %113 = vector.extract_strided_slice %112 {offsets = [0, 0], sizes = [2, 32], strides = [1, 1]} : vector<2x128xf32> to vector<2x32xf32>
    %114 = vector.extract_strided_slice %112 {offsets = [0, 32], sizes = [2, 32], strides = [1, 1]} : vector<2x128xf32> to vector<2x32xf32>
    %115 = vector.extract_strided_slice %112 {offsets = [0, 96], sizes = [2, 32], strides = [1, 1]} : vector<2x128xf32> to vector<2x32xf32>
    %116 = vector.extract_strided_slice %107 {offsets = [0, 64], sizes = [2, 32], strides = [1, 1]} : vector<2x128xf32> to vector<2x32xf32>
    %117 = math.tanh %116 : vector<2x32xf32>
    %118 = arith.mulf %114, %91 : vector<2x32xf32>
    %119 = arith.mulf %113, %117 : vector<2x32xf32>
    %120 = arith.addf %118, %119 : vector<2x32xf32>
    %121 = math.tanh %120 : vector<2x32xf32>
    %122 = arith.mulf %115, %121 : vector<2x32xf32>
    %cst_43 = arith.constant dense<0.000000e+00> : vector<2x128xf32>
    %123 = tpu.matmul %122, %5, %cst_43 {dimension_numbers = #tpu.dot_dimension_numbers<[1], [0], [0], [1], [0, 0, 1, 1], [], []>} : vector<2x32xf32>, vector<32x128xf32>, vector<2x128xf32> -> vector<2x128xf32>
    %124 = arith.addf %123, %11 : vector<2x128xf32>
    %125 = math.tanh %124 : vector<2x128xf32>
    %126 = arith.index_cast %c3_i32 : i32 to index
    %c0_44 = arith.constant 0 : index
    %c0_45 = arith.constant 0 : index
    %127 = vector.load %arg8[%126, %c0_44, %c0_45] : memref<8x2x128xf32, #tpu.memory_space<vmem>>, vector<1x2x128xf32>
    %128 = vector.shape_cast %127 : vector<1x2x128xf32> to vector<2x128xf32>
    %129 = vector.shape_cast %125 : vector<2x128xf32> to vector<1x2x128xf32>
    tpu.vector_store %arg8[%126, %c0_44, %c0_45], %129 {strides = array<i32>} : memref<8x2x128xf32, #tpu.memory_space<vmem>>, vector<1x2x128xf32>,
    %c4_i32 = arith.constant 4 : i32
    %130 = arith.index_cast %c4_i32 : i32 to index
    %c0_46 = arith.constant 0 : index
    %c0_47 = arith.constant 0 : index
    %131 = vector.load %arg2[%130, %c0_46, %c0_47] : memref<8x2x8xf32, #tpu.memory_space<vmem>>, vector<1x2x8xf32>
    %132 = vector.shape_cast %131 : vector<1x2x8xf32> to vector<2x8xf32>
    %cst_48 = arith.constant dense<0.000000e+00> : vector<2x128xf32>
    %133 = tpu.matmul %132, %3, %cst_48 {dimension_numbers = #tpu.dot_dimension_numbers<[1], [0], [0], [1], [0, 0, 1, 1], [], []>} : vector<2x8xf32>, vector<8x128xf32>, vector<2x128xf32> -> vector<2x128xf32>
    %cst_49 = arith.constant dense<0.000000e+00> : vector<2x128xf32>
    %134 = tpu.matmul %122, %4, %cst_49 {dimension_numbers = #tpu.dot_dimension_numbers<[1], [0], [0], [1], [0, 0, 1, 1], [], []>} : vector<2x32xf32>, vector<32x128xf32>, vector<2x128xf32> -> vector<2x128xf32>
    %135 = arith.addf %133, %134 : vector<2x128xf32>
    %136 = arith.addf %135, %8 : vector<2x128xf32>
    %137 = arith.negf %136 : vector<2x128xf32>
    %138 = math.exp %137 : vector<2x128xf32>
    %cst_50 = arith.constant 1.000000e+00 : f32
    %139 = vector.broadcast %cst_50 : f32 to vector<2x128xf32>
    %140 = arith.addf %139, %138 : vector<2x128xf32>
    %141 = arith.divf %139, %140 : vector<2x128xf32>
    %142 = vector.extract_strided_slice %141 {offsets = [0, 0], sizes = [2, 32], strides = [1, 1]} : vector<2x128xf32> to vector<2x32xf32>
    %143 = vector.extract_strided_slice %141 {offsets = [0, 32], sizes = [2, 32], strides = [1, 1]} : vector<2x128xf32> to vector<2x32xf32>
    %144 = vector.extract_strided_slice %141 {offsets = [0, 96], sizes = [2, 32], strides = [1, 1]} : vector<2x128xf32> to vector<2x32xf32>
    %145 = vector.extract_strided_slice %136 {offsets = [0, 64], sizes = [2, 32], strides = [1, 1]} : vector<2x128xf32> to vector<2x32xf32>
    %146 = math.tanh %145 : vector<2x32xf32>
    %147 = arith.mulf %143, %120 : vector<2x32xf32>
    %148 = arith.mulf %142, %146 : vector<2x32xf32>
    %149 = arith.addf %147, %148 : vector<2x32xf32>
    %150 = math.tanh %149 : vector<2x32xf32>
    %151 = arith.mulf %144, %150 : vector<2x32xf32>
    %cst_51 = arith.constant dense<0.000000e+00> : vector<2x128xf32>
    %152 = tpu.matmul %151, %5, %cst_51 {dimension_numbers = #tpu.dot_dimension_numbers<[1], [0], [0], [1], [0, 0, 1, 1], [], []>} : vector<2x32xf32>, vector<32x128xf32>, vector<2x128xf32> -> vector<2x128xf32>
    %153 = arith.addf %152, %11 : vector<2x128xf32>
    %154 = math.tanh %153 : vector<2x128xf32>
    %155 = arith.index_cast %c4_i32 : i32 to index
    %c0_52 = arith.constant 0 : index
    %c0_53 = arith.constant 0 : index
    %156 = vector.load %arg8[%155, %c0_52, %c0_53] : memref<8x2x128xf32, #tpu.memory_space<vmem>>, vector<1x2x128xf32>
    %157 = vector.shape_cast %156 : vector<1x2x128xf32> to vector<2x128xf32>
    %158 = vector.shape_cast %154 : vector<2x128xf32> to vector<1x2x128xf32>
    tpu.vector_store %arg8[%155, %c0_52, %c0_53], %158 {strides = array<i32>} : memref<8x2x128xf32, #tpu.memory_space<vmem>>, vector<1x2x128xf32>,
    %c5_i32 = arith.constant 5 : i32
    %159 = arith.index_cast %c5_i32 : i32 to index
    %c0_54 = arith.constant 0 : index
    %c0_55 = arith.constant 0 : index
    %160 = vector.load %arg2[%159, %c0_54, %c0_55] : memref<8x2x8xf32, #tpu.memory_space<vmem>>, vector<1x2x8xf32>
    %161 = vector.shape_cast %160 : vector<1x2x8xf32> to vector<2x8xf32>
    %cst_56 = arith.constant dense<0.000000e+00> : vector<2x128xf32>
    %162 = tpu.matmul %161, %3, %cst_56 {dimension_numbers = #tpu.dot_dimension_numbers<[1], [0], [0], [1], [0, 0, 1, 1], [], []>} : vector<2x8xf32>, vector<8x128xf32>, vector<2x128xf32> -> vector<2x128xf32>
    %cst_57 = arith.constant dense<0.000000e+00> : vector<2x128xf32>
    %163 = tpu.matmul %151, %4, %cst_57 {dimension_numbers = #tpu.dot_dimension_numbers<[1], [0], [0], [1], [0, 0, 1, 1], [], []>} : vector<2x32xf32>, vector<32x128xf32>, vector<2x128xf32> -> vector<2x128xf32>
    %164 = arith.addf %162, %163 : vector<2x128xf32>
    %165 = arith.addf %164, %8 : vector<2x128xf32>
    %166 = arith.negf %165 : vector<2x128xf32>
    %167 = math.exp %166 : vector<2x128xf32>
    %cst_58 = arith.constant 1.000000e+00 : f32
    %168 = vector.broadcast %cst_58 : f32 to vector<2x128xf32>
    %169 = arith.addf %168, %167 : vector<2x128xf32>
    %170 = arith.divf %168, %169 : vector<2x128xf32>
    %171 = vector.extract_strided_slice %170 {offsets = [0, 0], sizes = [2, 32], strides = [1, 1]} : vector<2x128xf32> to vector<2x32xf32>
    %172 = vector.extract_strided_slice %170 {offsets = [0, 32], sizes = [2, 32], strides = [1, 1]} : vector<2x128xf32> to vector<2x32xf32>
    %173 = vector.extract_strided_slice %170 {offsets = [0, 96], sizes = [2, 32], strides = [1, 1]} : vector<2x128xf32> to vector<2x32xf32>
    %174 = vector.extract_strided_slice %165 {offsets = [0, 64], sizes = [2, 32], strides = [1, 1]} : vector<2x128xf32> to vector<2x32xf32>
    %175 = math.tanh %174 : vector<2x32xf32>
    %176 = arith.mulf %172, %149 : vector<2x32xf32>
    %177 = arith.mulf %171, %175 : vector<2x32xf32>
    %178 = arith.addf %176, %177 : vector<2x32xf32>
    %179 = math.tanh %178 : vector<2x32xf32>
    %180 = arith.mulf %173, %179 : vector<2x32xf32>
    %cst_59 = arith.constant dense<0.000000e+00> : vector<2x128xf32>
    %181 = tpu.matmul %180, %5, %cst_59 {dimension_numbers = #tpu.dot_dimension_numbers<[1], [0], [0], [1], [0, 0, 1, 1], [], []>} : vector<2x32xf32>, vector<32x128xf32>, vector<2x128xf32> -> vector<2x128xf32>
    %182 = arith.addf %181, %11 : vector<2x128xf32>
    %183 = math.tanh %182 : vector<2x128xf32>
    %184 = arith.index_cast %c5_i32 : i32 to index
    %c0_60 = arith.constant 0 : index
    %c0_61 = arith.constant 0 : index
    %185 = vector.load %arg8[%184, %c0_60, %c0_61] : memref<8x2x128xf32, #tpu.memory_space<vmem>>, vector<1x2x128xf32>
    %186 = vector.shape_cast %185 : vector<1x2x128xf32> to vector<2x128xf32>
    %187 = vector.shape_cast %183 : vector<2x128xf32> to vector<1x2x128xf32>
    tpu.vector_store %arg8[%184, %c0_60, %c0_61], %187 {strides = array<i32>} : memref<8x2x128xf32, #tpu.memory_space<vmem>>, vector<1x2x128xf32>,
    %c6_i32 = arith.constant 6 : i32
    %188 = arith.index_cast %c6_i32 : i32 to index
    %c0_62 = arith.constant 0 : index
    %c0_63 = arith.constant 0 : index
    %189 = vector.load %arg2[%188, %c0_62, %c0_63] : memref<8x2x8xf32, #tpu.memory_space<vmem>>, vector<1x2x8xf32>
    %190 = vector.shape_cast %189 : vector<1x2x8xf32> to vector<2x8xf32>
    %cst_64 = arith.constant dense<0.000000e+00> : vector<2x128xf32>
    %191 = tpu.matmul %190, %3, %cst_64 {dimension_numbers = #tpu.dot_dimension_numbers<[1], [0], [0], [1], [0, 0, 1, 1], [], []>} : vector<2x8xf32>, vector<8x128xf32>, vector<2x128xf32> -> vector<2x128xf32>
    %cst_65 = arith.constant dense<0.000000e+00> : vector<2x128xf32>
    %192 = tpu.matmul %180, %4, %cst_65 {dimension_numbers = #tpu.dot_dimension_numbers<[1], [0], [0], [1], [0, 0, 1, 1], [], []>} : vector<2x32xf32>, vector<32x128xf32>, vector<2x128xf32> -> vector<2x128xf32>
    %193 = arith.addf %191, %192 : vector<2x128xf32>
    %194 = arith.addf %193, %8 : vector<2x128xf32>
    %195 = arith.negf %194 : vector<2x128xf32>
    %196 = math.exp %195 : vector<2x128xf32>
    %cst_66 = arith.constant 1.000000e+00 : f32
    %197 = vector.broadcast %cst_66 : f32 to vector<2x128xf32>
    %198 = arith.addf %197, %196 : vector<2x128xf32>
    %199 = arith.divf %197, %198 : vector<2x128xf32>
    %200 = vector.extract_strided_slice %199 {offsets = [0, 0], sizes = [2, 32], strides = [1, 1]} : vector<2x128xf32> to vector<2x32xf32>
    %201 = vector.extract_strided_slice %199 {offsets = [0, 32], sizes = [2, 32], strides = [1, 1]} : vector<2x128xf32> to vector<2x32xf32>
    %202 = vector.extract_strided_slice %199 {offsets = [0, 96], sizes = [2, 32], strides = [1, 1]} : vector<2x128xf32> to vector<2x32xf32>
    %203 = vector.extract_strided_slice %194 {offsets = [0, 64], sizes = [2, 32], strides = [1, 1]} : vector<2x128xf32> to vector<2x32xf32>
    %204 = math.tanh %203 : vector<2x32xf32>
    %205 = arith.mulf %201, %178 : vector<2x32xf32>
    %206 = arith.mulf %200, %204 : vector<2x32xf32>
    %207 = arith.addf %205, %206 : vector<2x32xf32>
    %208 = math.tanh %207 : vector<2x32xf32>
    %209 = arith.mulf %202, %208 : vector<2x32xf32>
    %cst_67 = arith.constant dense<0.000000e+00> : vector<2x128xf32>
    %210 = tpu.matmul %209, %5, %cst_67 {dimension_numbers = #tpu.dot_dimension_numbers<[1], [0], [0], [1], [0, 0, 1, 1], [], []>} : vector<2x32xf32>, vector<32x128xf32>, vector<2x128xf32> -> vector<2x128xf32>
    %211 = arith.addf %210, %11 : vector<2x128xf32>
    %212 = math.tanh %211 : vector<2x128xf32>
    %213 = arith.index_cast %c6_i32 : i32 to index
    %c0_68 = arith.constant 0 : index
    %c0_69 = arith.constant 0 : index
    %214 = vector.load %arg8[%213, %c0_68, %c0_69] : memref<8x2x128xf32, #tpu.memory_space<vmem>>, vector<1x2x128xf32>
    %215 = vector.shape_cast %214 : vector<1x2x128xf32> to vector<2x128xf32>
    %216 = vector.shape_cast %212 : vector<2x128xf32> to vector<1x2x128xf32>
    tpu.vector_store %arg8[%213, %c0_68, %c0_69], %216 {strides = array<i32>} : memref<8x2x128xf32, #tpu.memory_space<vmem>>, vector<1x2x128xf32>,
    %c7_i32 = arith.constant 7 : i32
    %217 = arith.index_cast %c7_i32 : i32 to index
    %c0_70 = arith.constant 0 : index
    %c0_71 = arith.constant 0 : index
    %218 = vector.load %arg2[%217, %c0_70, %c0_71] : memref<8x2x8xf32, #tpu.memory_space<vmem>>, vector<1x2x8xf32>
    %219 = vector.shape_cast %218 : vector<1x2x8xf32> to vector<2x8xf32>
    %cst_72 = arith.constant dense<0.000000e+00> : vector<2x128xf32>
    %220 = tpu.matmul %219, %3, %cst_72 {dimension_numbers = #tpu.dot_dimension_numbers<[1], [0], [0], [1], [0, 0, 1, 1], [], []>} : vector<2x8xf32>, vector<8x128xf32>, vector<2x128xf32> -> vector<2x128xf32>
    %cst_73 = arith.constant dense<0.000000e+00> : vector<2x128xf32>
    %221 = tpu.matmul %209, %4, %cst_73 {dimension_numbers = #tpu.dot_dimension_numbers<[1], [0], [0], [1], [0, 0, 1, 1], [], []>} : vector<2x32xf32>, vector<32x128xf32>, vector<2x128xf32> -> vector<2x128xf32>
    %222 = arith.addf %220, %221 : vector<2x128xf32>
    %223 = arith.addf %222, %8 : vector<2x128xf32>
    %224 = arith.negf %223 : vector<2x128xf32>
    %225 = math.exp %224 : vector<2x128xf32>
    %cst_74 = arith.constant 1.000000e+00 : f32
    %226 = vector.broadcast %cst_74 : f32 to vector<2x128xf32>
    %227 = arith.addf %226, %225 : vector<2x128xf32>
    %228 = arith.divf %226, %227 : vector<2x128xf32>
    %229 = vector.extract_strided_slice %228 {offsets = [0, 0], sizes = [2, 32], strides = [1, 1]} : vector<2x128xf32> to vector<2x32xf32>
    %230 = vector.extract_strided_slice %228 {offsets = [0, 32], sizes = [2, 32], strides = [1, 1]} : vector<2x128xf32> to vector<2x32xf32>
    %231 = vector.extract_strided_slice %228 {offsets = [0, 96], sizes = [2, 32], strides = [1, 1]} : vector<2x128xf32> to vector<2x32xf32>
    %232 = vector.extract_strided_slice %223 {offsets = [0, 64], sizes = [2, 32], strides = [1, 1]} : vector<2x128xf32> to vector<2x32xf32>
    %233 = math.tanh %232 : vector<2x32xf32>
    %234 = arith.mulf %230, %207 : vector<2x32xf32>
    %235 = arith.mulf %229, %233 : vector<2x32xf32>
    %236 = arith.addf %234, %235 : vector<2x32xf32>
    %237 = math.tanh %236 : vector<2x32xf32>
    %238 = arith.mulf %231, %237 : vector<2x32xf32>
    %cst_75 = arith.constant dense<0.000000e+00> : vector<2x128xf32>
    %239 = tpu.matmul %238, %5, %cst_75 {dimension_numbers = #tpu.dot_dimension_numbers<[1], [0], [0], [1], [0, 0, 1, 1], [], []>} : vector<2x32xf32>, vector<32x128xf32>, vector<2x128xf32> -> vector<2x128xf32>
    %240 = arith.addf %239, %11 : vector<2x128xf32>
    %241 = math.tanh %240 : vector<2x128xf32>
    %242 = arith.index_cast %c7_i32 : i32 to index
    %c0_76 = arith.constant 0 : index
    %c0_77 = arith.constant 0 : index
    %243 = vector.load %arg8[%242, %c0_76, %c0_77] : memref<8x2x128xf32, #tpu.memory_space<vmem>>, vector<1x2x128xf32>
    %244 = vector.shape_cast %243 : vector<1x2x128xf32> to vector<2x128xf32>
    %245 = vector.shape_cast %241 : vector<2x128xf32> to vector<1x2x128xf32>
    tpu.vector_store %arg8[%242, %c0_76, %c0_77], %245 {strides = array<i32>} : memref<8x2x128xf32, #tpu.memory_space<vmem>>, vector<1x2x128xf32>,
    %c8_i32 = arith.constant 8 : i32
    %c0_78 = arith.constant 0 : index
    %c0_79 = arith.constant 0 : index
    %246 = vector.load %arg9[%c0_78, %c0_79] : memref<2x32xf32, #tpu.memory_space<vmem>>, vector<2x32xf32>
    tpu.vector_store %arg9[%c0_78, %c0_79], %238 {strides = array<i32>} : memref<2x32xf32, #tpu.memory_space<vmem>>, vector<2x32xf32>,
    %c0_80 = arith.constant 0 : index
    %c0_81 = arith.constant 0 : index
    %247 = vector.load %arg10[%c0_80, %c0_81] : memref<2x32xf32, #tpu.memory_space<vmem>>, vector<2x32xf32>
    tpu.vector_store %arg10[%c0_80, %c0_81], %236 {strides = array<i32>} : memref<2x32xf32, #tpu.memory_space<vmem>>, vector<2x32xf32>,
    return
  }
  func.func @transform_0(%arg0: i32, %arg1: i32) -> (i32, i32, i32) {
    %c0_i32 = arith.constant 0 : i32
    %c0_i32_0 = arith.constant 0 : i32
    return %arg1, %arg0, %c0_i32 : i32, i32, i32
  }
  func.func @transform_1(%arg0: i32, %arg1: i32) -> (i32, i32) {
    %c0_i32 = arith.constant 0 : i32
    %c0_i32_0 = arith.constant 0 : i32
    %c0_i32_1 = arith.constant 0 : i32
    return %c0_i32, %c0_i32_0 : i32, i32
  }
  func.func @transform_2(%arg0: i32, %arg1: i32) -> (i32, i32) {
    %c0_i32 = arith.constant 0 : i32
    %c0_i32_0 = arith.constant 0 : i32
    %c0_i32_1 = arith.constant 0 : i32
    return %c0_i32, %c0_i32_0 : i32, i32
  }
  func.func @transform_3(%arg0: i32, %arg1: i32) -> (i32, i32) {
    %c0_i32 = arith.constant 0 : i32
    %c0_i32_0 = arith.constant 0 : i32
    %c0_i32_1 = arith.constant 0 : i32
    return %c0_i32, %c0_i32_0 : i32, i32
  }
  func.func @transform_4(%arg0: i32, %arg1: i32) -> (i32, i32) {
    %c0_i32 = arith.constant 0 : i32
    %c0_i32_0 = arith.constant 0 : i32
    %c0_i32_1 = arith.constant 0 : i32
    return %c0_i32, %c0_i32_0 : i32, i32
  }
  func.func @transform_5(%arg0: i32, %arg1: i32) -> (i32, i32) {
    %c0_i32 = arith.constant 0 : i32
    %c0_i32_0 = arith.constant 0 : i32
    %c0_i32_1 = arith.constant 0 : i32
    return %c0_i32, %c0_i32_0 : i32, i32
  }
  func.func @transform_6(%arg0: i32, %arg1: i32) -> (i32, i32, i32) {
    %c0_i32 = arith.constant 0 : i32
    %c0_i32_0 = arith.constant 0 : i32
    return %arg1, %arg0, %c0_i32 : i32, i32, i32
  }
}

</mosaic_0001>

<bundles_post_ra>
// kernel: lstm_model_forward.1
= control target key start
LH: loop header
LB: loop body
LE: loop exit
PB: predicated region body
PF: predicated region fallthrough
CT: control target
= control target key end

     0   :  { %vm27_vm0 = vcmask 254976   ;;  %v2600_v0 = vmov 0.0|0.0   ;;  %vm2601_vm1 = vmmov 0   ;;  %v2602_v4 = vmov 0.0   ;;  %s2603_s9 = smov 64   ;;  %s2604_s10 = smov 32   ;;  %s2947_s3 = inlined_call_operand.vmem [shape: f32[32,128], index: 3, kind: input, shape index: {}]   ;;  %s2948_s1 = inlined_call_operand.vmem [shape: f32[8,128], index: 1, kind: input, shape index: {}]   ;;  %s2949_s0 = inlined_call_operand.vmem [shape: f32[8,2,8], index: 0, kind: input, shape index: {}]   ;;  %s2950_s2 = inlined_call_operand.vmem [shape: f32[1,128], index: 2, kind: input, shape index: {}]   ;;  %s2951_s4 = inlined_call_operand.vmem [shape: f32[32,128], index: 4, kind: input, shape index: {}]   ;;  %s2952_s5 = inlined_call_operand.vmem [shape: f32[1,128], index: 5, kind: input, shape index: {}]   ;;  %s2953_s6 = inlined_call_operand.vmem [shape: f32[8,2,128], index: 6, kind: output, shape index: {}]  }
   0x1   :  { %2418 = vmatprep.subr.bf16.mxu0 %v2600_v0  ;;  %v31_v1 = vld [vmem:[%s2947_s3] sm:$0xff]  ;;  %v32_v2 = vld [vmem:[%s2947_s3 + $0x8] sm:$0xff]  ;;  %v33_v3 = vld [vmem:[%s2947_s3 + $0x10] sm:$0xff]  ;;  %2210 = vmatprep.mubr.msk.f32.mxu0 %vm2601_vm1, %v2602_v4  ;;  %28 = vst.msk [vmem:[#allocation2] sm:$0x3] %vm27_vm0, %v2602_v4  ;;  %vm56_vm2 = vcmask 261120  }
   0x2   :  { %29 = vst.msk [vmem:[#allocation3] sm:$0x3] %vm27_vm0, %v2602_v4  ;;  %v2657_v5 = vpack.c.bf16 %v32_v2, %v31_v1  ;;  %v34_v6 = vld [vmem:[%s2947_s3 + $0x18] sm:$0xff]  ;;  %2424 = vmatprep.subr.bf16.mxu1 %v2600_v0  ;;  %2226 = vmatprep.mubr.msk.f32.mxu1 %vm2601_vm1, %v2602_v4  ;;  %v2674_v9 = vld [vmem:[%s2948_s1] sm:$0xff]  ;;  %vm130_vm3 = vcmask 64512   ;;  %v36_v31 = vld [vmem:[%s2951_s4 + $0x8] sm:$0xff] }
   0x3   :  { %v2666_v7 = vpack.c.bf16 %v34_v6, %v33_v3  ;;  %v55_v10 = vld [vmem:[%s2949_s0] sm:$0x3]  ;;  %v37_v32 = vld [vmem:[%s2951_s4 + $0x10] sm:$0xff]  ;;  %v38_v34 = vld [vmem:[%s2951_s4 + $0x18] sm:$0xff]  ;;  %s2605_s19 = smov 96  }
   0x4   :  { %2420 = vmatpush3.bf16.msra.mxu0 %v2657_v5  ;;  %v2694_v13 = vld [vmem:[%s2950_s2] ss:$0 sm:$0xff]  ;;  %v2718_v35 = vpack.c.bf16 %v38_v34, %v37_v32  ;;  %v2064_v40 = vld [vmem:[%s2949_s0 + $0x2] sm:$0x3]  ;;  %v2070_v3 = vld [vmem:[%s2949_s0 + $0x4] sm:$0x3] }
   0x5   :  { %2421 = vmatprep.subr.bf16.mxu0 %v2600_v0  ;;  %v35_v30 = vld [vmem:[%s2951_s4] sm:$0xff] }
   0x6   :  { %v2712_v33 = vpack.c.bf16 %v36_v31, %v35_v30  ;;  %v2750_v41 = vld [vmem:[%s2952_s5] ss:$0 sm:$0xff]  ;;  %v2076_v34 = vld [vmem:[%s2949_s0 + $0x6] sm:$0x3] }
   0x8   :  { %2423 = vmatpush3.bf16.msra.mxu0 %v2666_v7  ;;  %v53_v8 = vld [vmem:[#allocation2] sm:$0x3]  ;;  %2426 = vmatpush3.bf16.msra.mxu1 %v2712_v33 }
   0x9   :  { %2213 = vmatprep.subr.mxu0 %v2602_v4  ;;  %v54_v19 = vld [vmem:[#allocation3] sm:$0x3]  ;;  %2427 = vmatprep.subr.bf16.mxu1 %v2600_v0 }
   0xb   :  { %2211 = vmatmul.mubr.msk.f32.vlgmr.msra.gmra.mrb[0].mxu0 %vm56_vm2, %v53_v8 }
   0xc   :  { %2214 = vmatpush3.msra.mxu0 %v2674_v9  ;;  %2215 = vmatprep.mubr.msk.f32.mxu0 %vm2601_vm1, %v2602_v4 }
   0xd   :  { %2430 = vmatprep.subr.bf16.mxu0 %v2600_v0  ;;  %2429 = vmatpush3.bf16.msra.mxu1 %v2718_v35 }
   0xe   :  { %2240 = vmatprep.subr.mxu1 %v2602_v4 }
   0xf   :  { %2216 = vmatmul.mubr.msk.f32.vlgmr.msra.gmra.mrb[2].mxu0 %vm130_vm3, %v55_v10 }
  0x10   :  { %2432 = vmatpush3.bf16.msra.mxu0 %v2657_v5  ;;  %2237 = vmatprep.mubr.msk.f32.mxu0 %vm2601_vm1, %v2602_v4 }
  0x11   :  { %2433 = vmatprep.subr.bf16.mxu0 %v2600_v0 }
  0x14   :  { %2435 = vmatpush3.bf16.msra.mxu0 %v2666_v7 }
  0x15   :  { %2442 = vmatprep.subr.bf16.mxu0 %v2600_v0 }
  0xde   :  { %v126_v11 = vpop.f32.mrb[0].mxu0 }
  0xdf   :  { %v2212_v12 = vpop.f32.mrb[1].mxu0 }
  0xe2   :  { %v200_v14 = vpop.f32.mrb[2].mxu0 }
  0xe3   :  { %v201_v15 = vadd.f32 %v200_v14, %v126_v11  ;;  %v2217_v16 = vpop.f32.mrb[3].mxu0 }
  0xe5   :  { %v204_v17 = vadd.f32 %v2694_v13, %v201_v15 }
  0xe7   :  { %2520 = vtanh.f32 %v204_v17  ;;  %v2062_v20 = vmul.f32 -1.442695, %v204_v17 }
  0xe9   :  { %2522 = vpow2.f32 %v2062_v20 }
  0xf1   :  { %v2521_v18 = vpop.eup %2520 }
  0xf2   :  { %218 = vrot.lane.b32.xlu0 %v2521_v18, %s2603_s9 }
  0xf3   :  { %v2523_v21 = vpop.eup %2522 }
  0xf4   :  { %v208_v22 = vadd.f32 1.0, %v2523_v21 }
  0xf6   :  { %213 = vrot.lane.b32.xlu0 %v54_v19, %s2604_s10  ;;  %2524 = vrcp.f32 %v208_v22 }
 0x100   :  { %v2525_v23 = vpop.eup %2524 }
 0x164   :  { %v219_v24 = vpop.permute.xlu0 %218 }
 0x165   :  { %v221_v25 = vmul.f32 %v2525_v23, %v219_v24 }
 0x167   :  { %223 = vrot.lane.b32.xlu1 %v221_v25, %s2604_s10 }
 0x168   :  { %v214_v26 = vpop.permute.xlu0 %213 }
 0x169   :  { %v216_v27 = vmul.f32 %v2525_v23, %v214_v26 }
 0x1d9   :  { %v224_v28 = vpop.permute.xlu1 %223 }
 0x1da   :  { %v2700_v29 = vadd.f32 %v224_v28, %v216_v27 }
 0x1dc   :  { %2526 = vtanh.f32 %v2700_v29 }
 0x1e6   :  { %v2527_v36 = vpop.eup %2526 }
 0x1e7   :  { %229 = vrot.lane.b32.xlu1 %v2527_v36, %s2603_s9 }
 0x259   :  { %v230_v37 = vpop.permute.xlu1 %229 }
 0x25a   :  { %v232_v38 = vmul.f32 %v2525_v23, %v230_v37 }
 0x25c   :  { %234 = vrot.lane.b32.xlu0 %v232_v38, %s2604_s10 }
 0x2ce   :  { %v235_v39 = vpop.permute.xlu0 %234 }
 0x2cf   :  { %2227 = vmatmul.mubr.msk.f32.vlgmr.msra.gmra.mrb[0].mxu1 %vm56_vm2, %v235_v39  ;;  %2238 = vmatmul.mubr.msk.f32.vlgmr.msra.gmra.mrb[4].mxu0 %vm56_vm2, %v235_v39 }
 0x2d0   :  { %2241 = vmatpush3.msra.mxu1 %v2674_v9  ;;  %2242 = vmatprep.mubr.msk.f32.mxu1 %vm2601_vm1, %v2602_v4 }
 0x2d1   :  { %2436 = vmatprep.subr.bf16.mxu1 %v2600_v0  ;;  %2444 = vmatpush3.bf16.msra.mxu0 %v2657_v5 }
 0x2d2   :  { %2445 = vmatprep.subr.bf16.mxu0 %v2600_v0  ;;  %2264 = vmatprep.mubr.msk.f32.mxu0 %vm2601_vm1, %v2602_v4 }
 0x2d3   :  { %2243 = vmatmul.mubr.msk.f32.vlgmr.msra.gmra.mrb[2].mxu1 %vm130_vm3, %v2064_v40 }
 0x2d4   :  { %2438 = vmatpush3.bf16.msra.mxu1 %v2712_v33  ;;  %2253 = vmatprep.mubr.msk.f32.mxu1 %vm2601_vm1, %v2602_v4 }
 0x2d5   :  { %2439 = vmatprep.subr.bf16.mxu1 %v2600_v0  ;;  %2447 = vmatpush3.bf16.msra.mxu0 %v2666_v7 }
 0x2d6   :  { %2448 = vmatprep.subr.bf16.mxu0 %v2600_v0 }
 0x2d8   :  { %2441 = vmatpush3.bf16.msra.mxu1 %v2718_v35 }
 0x2d9   :  { %2267 = vmatprep.subr.mxu1 %v2602_v4 }
 0x3a2   :  { %v304_v42 = vpop.f32.mrb[0].mxu1  ;;  %v378_v43 = vpop.f32.mrb[4].mxu0 }
 0x3a3   :  { %v305_v44 = vadd.f32 %v2750_v41, %v304_v42  ;;  %v2228_v45 = vpop.f32.mrb[1].mxu1  ;;  %v2239_v46 = vpop.f32.mrb[5].mxu0 }
 0x3a5   :  { %2528 = vtanh.f32 %v305_v44 }
 0x3a6   :  { %v451_v47 = vpop.f32.mrb[2].mxu1 }
 0x3a7   :  { %v452_v48 = vadd.f32 %v451_v47, %v378_v43  ;;  %v2244_v49 = vpop.f32.mrb[3].mxu1 }
 0x3a9   :  { %v455_v50 = vadd.f32 %v2694_v13, %v452_v48 }
 0x3ab   :  { %2530 = vtanh.f32 %v455_v50  ;;  %v2067_v53 = vmul.f32 -1.442695, %v455_v50 }
 0x3ad   :  { %2532 = vpow2.f32 %v2067_v53 }
 0x3af   :  { %v2529_v51 = vpop.eup %2528 }
 0x3b0   :  { %309 = vst [vmem:[%s2953_s6] sm:$0x3] %v2529_v51 }
 0x3b5   :  { %v2531_v52 = vpop.eup %2530 }
 0x3b6   :  { %465 = vrot.lane.b32.xlu1 %v2531_v52, %s2603_s9 }
 0x3b7   :  { %v2533_v54 = vpop.eup %2532 }
 0x3b8   :  { %v459_v55 = vadd.f32 1.0, %v2533_v54 }
 0x3ba   :  { %2534 = vrcp.f32 %v459_v55 }
 0x3c4   :  { %v2535_v56 = vpop.eup %2534 }
 0x3c5   :  { %v463_v59 = vmul.f32 %v2535_v56, %v2700_v29 }
 0x428   :  { %v466_v57 = vpop.permute.xlu1 %465 }
 0x429   :  { %v468_v58 = vmul.f32 %v2535_v56, %v466_v57 }
 0x42b   :  { %470 = vrot.lane.b32.xlu0 %v468_v58, %s2604_s10 }
 0x49d   :  { %v471_v60 = vpop.permute.xlu0 %470 }
 0x49e   :  { %v473_v61 = vadd.f32 %v471_v60, %v463_v59 }
 0x4a0   :  { %2536 = vtanh.f32 %v473_v61 }
 0x4aa   :  { %v2537_v62 = vpop.eup %2536 }
 0x4ab   :  { %476 = vrot.lane.b32.xlu1 %v2537_v62, %s2603_s9 }
 0x51d   :  { %v477_v63 = vpop.permute.xlu1 %476 }
 0x51e   :  { %v479_v1 = vmul.f32 %v2535_v56, %v477_v63 }
 0x520   :  { %481 = vrot.lane.b32.xlu0 %v479_v1, %s2604_s10 }
 0x592   :  { %v482_v2 = vpop.permute.xlu0 %481 }
 0x593   :  { %2254 = vmatmul.mubr.msk.f32.vlgmr.msra.gmra.mrb[4].mxu1 %vm56_vm2, %v482_v2  ;;  %2265 = vmatmul.mubr.msk.f32.vlgmr.msra.gmra.mrb[6].mxu0 %vm56_vm2, %v482_v2 }
 0x594   :  { %2268 = vmatpush3.msra.mxu1 %v2674_v9  ;;  %2269 = vmatprep.mubr.msk.f32.mxu1 %vm2601_vm1, %v2602_v4 }
 0x595   :  { %2454 = vmatprep.subr.bf16.mxu1 %v2600_v0  ;;  %2450 = vmatpush3.bf16.msra.mxu0 %v2712_v33 }
 0x596   :  { %2451 = vmatprep.subr.bf16.mxu0 %v2600_v0  ;;  %2280 = vmatprep.mubr.msk.f32.mxu0 %vm2601_vm1, %v2602_v4 }
 0x597   :  { %2270 = vmatmul.mubr.msk.f32.vlgmr.msra.gmra.mrb[6].mxu1 %vm130_vm3, %v2070_v3 }
 0x598   :  { %2456 = vmatpush3.bf16.msra.mxu1 %v2657_v5  ;;  %2291 = vmatprep.mubr.msk.f32.mxu1 %vm2601_vm1, %v2602_v4 }
 0x599   :  { %2457 = vmatprep.subr.bf16.mxu1 %v2600_v0  ;;  %2453 = vmatpush3.bf16.msra.mxu0 %v2718_v35 }
 0x59a   :  { %2294 = vmatprep.subr.mxu0 %v2602_v4 }
 0x59c   :  { %2459 = vmatpush3.bf16.msra.mxu1 %v2666_v7 }
 0x59d   :  { %2460 = vmatprep.subr.bf16.mxu1 %v2600_v0 }
 0x666   :  { %v551_v6 = vpop.f32.mrb[4].mxu1  ;;  %v626_v8 = vpop.f32.mrb[6].mxu0 }
 0x667   :  { %v552_v10 = vadd.f32 %v2750_v41, %v551_v6  ;;  %v2255_v11 = vpop.f32.mrb[5].mxu1  ;;  %v2266_v12 = vpop.f32.mrb[7].mxu0 }
 0x669   :  { %2538 = vtanh.f32 %v552_v10 }
 0x66a   :  { %v699_v14 = vpop.f32.mrb[6].mxu1 }
 0x66b   :  { %v700_v15 = vadd.f32 %v699_v14, %v626_v8  ;;  %v2271_v16 = vpop.f32.mrb[7].mxu1 }
 0x66d   :  { %v703_v17 = vadd.f32 %v2694_v13, %v700_v15 }
 0x66f   :  { %2540 = vtanh.f32 %v703_v17  ;;  %v2073_v20 = vmul.f32 -1.442695, %v703_v17 }
 0x671   :  { %2542 = vpow2.f32 %v2073_v20 }
 0x673   :  { %v2539_v18 = vpop.eup %2538 }
 0x674   :  { %2069 = vst [vmem:[%s2953_s6 + $0x2] sm:$0x3] %v2539_v18 }
 0x679   :  { %v2541_v19 = vpop.eup %2540 }
 0x67a   :  { %713 = vrot.lane.b32.xlu1 %v2541_v19, %s2603_s9 }
 0x67b   :  { %v2543_v21 = vpop.eup %2542 }
 0x67c   :  { %v707_v22 = vadd.f32 1.0, %v2543_v21 }
 0x67e   :  { %2544 = vrcp.f32 %v707_v22 }
 0x688   :  { %v2545_v23 = vpop.eup %2544 }
 0x689   :  { %v711_v26 = vmul.f32 %v2545_v23, %v473_v61  ;;  %v2082_v61 = vld [vmem:[%s2949_s0 + $0x8] sm:$0x3] }
 0x6ec   :  { %v714_v24 = vpop.permute.xlu1 %713 }
 0x6ed   :  { %v716_v25 = vmul.f32 %v2545_v23, %v714_v24 }
 0x6ef   :  { %718 = vrot.lane.b32.xlu0 %v716_v25, %s2604_s10 }
 0x761   :  { %v719_v27 = vpop.permute.xlu0 %718 }
 0x762   :  { %v721_v28 = vadd.f32 %v719_v27, %v711_v26 }
 0x764   :  { %2546 = vtanh.f32 %v721_v28 }
 0x76e   :  { %v2547_v29 = vpop.eup %2546 }
 0x76f   :  { %724 = vrot.lane.b32.xlu1 %v2547_v29, %s2603_s9 }
 0x7e1   :  { %v725_v30 = vpop.permute.xlu1 %724 }
 0x7e2   :  { %v727_v31 = vmul.f32 %v2545_v23, %v725_v30 }
 0x7e4   :  { %729 = vrot.lane.b32.xlu0 %v727_v31, %s2604_s10 }
 0x856   :  { %v730_v32 = vpop.permute.xlu0 %729 }
 0x857   :  { %2281 = vmatmul.mubr.msk.f32.vlgmr.msra.gmra.mrb[8].mxu0 %vm56_vm2, %v730_v32  ;;  %2292 = vmatmul.mubr.msk.f32.vlgmr.msra.gmra.mrb[8].mxu1 %vm56_vm2, %v730_v32 }
 0x858   :  { %2295 = vmatpush3.msra.mxu0 %v2674_v9  ;;  %2296 = vmatprep.mubr.msk.f32.mxu0 %vm2601_vm1, %v2602_v4 }
 0x859   :  { %2466 = vmatprep.subr.bf16.mxu0 %v2600_v0  ;;  %2462 = vmatpush3.bf16.msra.mxu1 %v2712_v33 }
 0x85a   :  { %2463 = vmatprep.subr.bf16.mxu1 %v2600_v0  ;;  %2307 = vmatprep.mubr.msk.f32.mxu1 %vm2601_vm1, %v2602_v4 }
 0x85b   :  { %2297 = vmatmul.mubr.msk.f32.vlgmr.msra.gmra.mrb[10].mxu0 %vm130_vm3, %v2076_v34 }
 0x85c   :  { %2468 = vmatpush3.bf16.msra.mxu0 %v2657_v5  ;;  %2318 = vmatprep.mubr.msk.f32.mxu0 %vm2601_vm1, %v2602_v4 }
 0x85d   :  { %2469 = vmatprep.subr.bf16.mxu0 %v2600_v0  ;;  %2465 = vmatpush3.bf16.msra.mxu1 %v2718_v35 }
 0x85e   :  { %2321 = vmatprep.subr.mxu1 %v2602_v4 }
 0x860   :  { %2471 = vmatpush3.bf16.msra.mxu0 %v2666_v7 }
 0x861   :  { %2472 = vmatprep.subr.bf16.mxu0 %v2600_v0 }
 0x92a   :  { %v799_v36 = vpop.f32.mrb[8].mxu0  ;;  %v874_v37 = vpop.f32.mrb[8].mxu1 }
 0x92b   :  { %v800_v38 = vadd.f32 %v2750_v41, %v799_v36  ;;  %v2282_v39 = vpop.f32.mrb[9].mxu0  ;;  %v2293_v40 = vpop.f32.mrb[9].mxu1 }
 0x92d   :  { %2548 = vtanh.f32 %v800_v38 }
 0x92e   :  { %v947_v42 = vpop.f32.mrb[10].mxu0 }
 0x92f   :  { %v948_v43 = vadd.f32 %v947_v42, %v874_v37  ;;  %v2298_v44 = vpop.f32.mrb[11].mxu0 }
 0x931   :  { %v951_v45 = vadd.f32 %v2694_v13, %v948_v43 }
 0x933   :  { %2550 = vtanh.f32 %v951_v45  ;;  %v2079_v48 = vmul.f32 -1.442695, %v951_v45 }
 0x935   :  { %2552 = vpow2.f32 %v2079_v48 }
 0x937   :  { %v2549_v46 = vpop.eup %2548 }
 0x938   :  { %2075 = vst [vmem:[%s2953_s6 + $0x4] sm:$0x3] %v2549_v46 }
 0x93d   :  { %v2551_v47 = vpop.eup %2550 }
 0x93e   :  { %961 = vrot.lane.b32.xlu1 %v2551_v47, %s2603_s9 }
 0x93f   :  { %v2553_v49 = vpop.eup %2552 }
 0x940   :  { %v955_v50 = vadd.f32 1.0, %v2553_v49 }
 0x942   :  { %2554 = vrcp.f32 %v955_v50 }
 0x94c   :  { %v2555_v51 = vpop.eup %2554 }
 0x94d   :  { %v959_v54 = vmul.f32 %v2555_v51, %v721_v28  ;;  %v2088_v28 = vld [vmem:[%s2949_s0 + $0xa] sm:$0x3] }
 0x9b0   :  { %v962_v52 = vpop.permute.xlu1 %961 }
 0x9b1   :  { %v964_v53 = vmul.f32 %v2555_v51, %v962_v52 }
 0x9b3   :  { %966 = vrot.lane.b32.xlu0 %v964_v53, %s2604_s10 }
 0xa25   :  { %v967_v55 = vpop.permute.xlu0 %966 }
 0xa26   :  { %v969_v56 = vadd.f32 %v967_v55, %v959_v54 }
 0xa28   :  { %2556 = vtanh.f32 %v969_v56 }
 0xa32   :  { %v2557_v57 = vpop.eup %2556 }
 0xa33   :  { %972 = vrot.lane.b32.xlu1 %v2557_v57, %s2603_s9 }
 0xaa5   :  { %v973_v58 = vpop.permute.xlu1 %972 }
 0xaa6   :  { %v975_v59 = vmul.f32 %v2555_v51, %v973_v58 }
 0xaa8   :  { %977 = vrot.lane.b32.xlu0 %v975_v59, %s2604_s10 }
 0xb1a   :  { %v978_v60 = vpop.permute.xlu0 %977 }
 0xb1b   :  { %2308 = vmatmul.mubr.msk.f32.vlgmr.msra.gmra.mrb[10].mxu1 %vm56_vm2, %v978_v60  ;;  %2319 = vmatmul.mubr.msk.f32.vlgmr.msra.gmra.mrb[12].mxu0 %vm56_vm2, %v978_v60 }
 0xb1c   :  { %2322 = vmatpush3.msra.mxu1 %v2674_v9  ;;  %2323 = vmatprep.mubr.msk.f32.mxu1 %vm2601_vm1, %v2602_v4 }
 0xb1d   :  { %2478 = vmatprep.subr.bf16.mxu1 %v2600_v0  ;;  %2474 = vmatpush3.bf16.msra.mxu0 %v2712_v33 }
 0xb1e   :  { %2475 = vmatprep.subr.bf16.mxu0 %v2600_v0  ;;  %2334 = vmatprep.mubr.msk.f32.mxu0 %vm2601_vm1, %v2602_v4 }
 0xb1f   :  { %2324 = vmatmul.mubr.msk.f32.vlgmr.msra.gmra.mrb[12].mxu1 %vm130_vm3, %v2082_v61 }
 0xb20   :  { %2480 = vmatpush3.bf16.msra.mxu1 %v2657_v5  ;;  %2345 = vmatprep.mubr.msk.f32.mxu1 %vm2601_vm1, %v2602_v4 }
 0xb21   :  { %2481 = vmatprep.subr.bf16.mxu1 %v2600_v0  ;;  %2477 = vmatpush3.bf16.msra.mxu0 %v2718_v35 }
 0xb22   :  { %2348 = vmatprep.subr.mxu0 %v2602_v4 }
 0xb24   :  { %2483 = vmatpush3.bf16.msra.mxu1 %v2666_v7 }
 0xb25   :  { %2484 = vmatprep.subr.bf16.mxu1 %v2600_v0 }
 0xbee   :  { %v1047_v62 = vpop.f32.mrb[10].mxu1  ;;  %v1122_v63 = vpop.f32.mrb[12].mxu0 }
 0xbef   :  { %v1048_v1 = vadd.f32 %v2750_v41, %v1047_v62  ;;  %v2309_v2 = vpop.f32.mrb[11].mxu1  ;;  %v2320_v3 = vpop.f32.mrb[13].mxu0 }
 0xbf1   :  { %2558 = vtanh.f32 %v1048_v1 }
 0xbf2   :  { %v1195_v6 = vpop.f32.mrb[12].mxu1 }
 0xbf3   :  { %v1196_v8 = vadd.f32 %v1195_v6, %v1122_v63  ;;  %v2325_v10 = vpop.f32.mrb[13].mxu1 }
 0xbf5   :  { %v1199_v11 = vadd.f32 %v2694_v13, %v1196_v8 }
 0xbf7   :  { %2560 = vtanh.f32 %v1199_v11  ;;  %v2085_v15 = vmul.f32 -1.442695, %v1199_v11 }
 0xbf9   :  { %2562 = vpow2.f32 %v2085_v15 }
 0xbfb   :  { %v2559_v12 = vpop.eup %2558 }
 0xbfc   :  { %2081 = vst [vmem:[%s2953_s6 + $0x6] sm:$0x3] %v2559_v12 }
 0xc01   :  { %v2561_v14 = vpop.eup %2560 }
 0xc02   :  { %1209 = vrot.lane.b32.xlu1 %v2561_v14, %s2603_s9 }
 0xc03   :  { %v2563_v16 = vpop.eup %2562 }
 0xc04   :  { %v1203_v17 = vadd.f32 1.0, %v2563_v16 }
 0xc06   :  { %2564 = vrcp.f32 %v1203_v17 }
 0xc10   :  { %v2565_v18 = vpop.eup %2564 }
 0xc11   :  { %v1207_v21 = vmul.f32 %v2565_v18, %v969_v56  ;;  %v2094_v56 = vld [vmem:[%s2949_s0 + $0xc] sm:$0x3] }
 0xc74   :  { %v1210_v19 = vpop.permute.xlu1 %1209 }
 0xc75   :  { %v1212_v20 = vmul.f32 %v2565_v18, %v1210_v19 }
 0xc77   :  { %1214 = vrot.lane.b32.xlu0 %v1212_v20, %s2604_s10 }
 0xce9   :  { %v1215_v22 = vpop.permute.xlu0 %1214 }
 0xcea   :  { %v1217_v23 = vadd.f32 %v1215_v22, %v1207_v21  ;;  %v2100_v21 = vld [vmem:[%s2949_s0 + $0xe] sm:$0x3] }
 0xcec   :  { %2566 = vtanh.f32 %v1217_v23 }
 0xcf6   :  { %v2567_v24 = vpop.eup %2566 }
 0xcf7   :  { %1220 = vrot.lane.b32.xlu1 %v2567_v24, %s2603_s9 }
 0xd69   :  { %v1221_v25 = vpop.permute.xlu1 %1220 }
 0xd6a   :  { %v1223_v26 = vmul.f32 %v2565_v18, %v1221_v25 }
 0xd6c   :  { %1225 = vrot.lane.b32.xlu0 %v1223_v26, %s2604_s10 }
 0xdde   :  { %v1226_v27 = vpop.permute.xlu0 %1225 }
 0xddf   :  { %2335 = vmatmul.mubr.msk.f32.vlgmr.msra.gmra.mrb[14].mxu0 %vm56_vm2, %v1226_v27  ;;  %2346 = vmatmul.mubr.msk.f32.vlgmr.msra.gmra.mrb[14].mxu1 %vm56_vm2, %v1226_v27 }
 0xde0   :  { %2349 = vmatpush3.msra.mxu0 %v2674_v9  ;;  %2350 = vmatprep.mubr.msk.f32.mxu0 %vm2601_vm1, %v2602_v4 }
 0xde1   :  { %2490 = vmatprep.subr.bf16.mxu0 %v2600_v0  ;;  %2486 = vmatpush3.bf16.msra.mxu1 %v2712_v33 }
 0xde2   :  { %2487 = vmatprep.subr.bf16.mxu1 %v2600_v0  ;;  %2361 = vmatprep.mubr.msk.f32.mxu1 %vm2601_vm1, %v2602_v4 }
 0xde3   :  { %2351 = vmatmul.mubr.msk.f32.vlgmr.msra.gmra.mrb[16].mxu0 %vm130_vm3, %v2088_v28 }
 0xde4   :  { %2492 = vmatpush3.bf16.msra.mxu0 %v2657_v5  ;;  %2372 = vmatprep.mubr.msk.f32.mxu0 %vm2601_vm1, %v2602_v4 }
 0xde5   :  { %2493 = vmatprep.subr.bf16.mxu0 %v2600_v0  ;;  %2489 = vmatpush3.bf16.msra.mxu1 %v2718_v35 }
 0xde6   :  { %2375 = vmatprep.subr.mxu1 %v2602_v4 }
 0xde8   :  { %2495 = vmatpush3.bf16.msra.mxu0 %v2666_v7 }
 0xde9   :  { %2496 = vmatprep.subr.bf16.mxu0 %v2600_v0 }
 0xeb2   :  { %v1295_v29 = vpop.f32.mrb[14].mxu0  ;;  %v1370_v30 = vpop.f32.mrb[14].mxu1 }
 0xeb3   :  { %v1296_v31 = vadd.f32 %v2750_v41, %v1295_v29  ;;  %v2336_v32 = vpop.f32.mrb[15].mxu0  ;;  %v2347_v34 = vpop.f32.mrb[15].mxu1 }
 0xeb5   :  { %2568 = vtanh.f32 %v1296_v31 }
 0xeb6   :  { %v1443_v36 = vpop.f32.mrb[16].mxu0 }
 0xeb7   :  { %v1444_v37 = vadd.f32 %v1443_v36, %v1370_v30  ;;  %v2352_v38 = vpop.f32.mrb[17].mxu0 }
 0xeb9   :  { %v1447_v39 = vadd.f32 %v2694_v13, %v1444_v37 }
 0xebb   :  { %2570 = vtanh.f32 %v1447_v39  ;;  %v2091_v43 = vmul.f32 -1.442695, %v1447_v39 }
 0xebd   :  { %2572 = vpow2.f32 %v2091_v43 }
 0xebf   :  { %v2569_v40 = vpop.eup %2568 }
 0xec0   :  { %2087 = vst [vmem:[%s2953_s6 + $0x8] sm:$0x3] %v2569_v40 }
 0xec5   :  { %v2571_v42 = vpop.eup %2570 }
 0xec6   :  { %1457 = vrot.lane.b32.xlu1 %v2571_v42, %s2603_s9 }
 0xec7   :  { %v2573_v44 = vpop.eup %2572 }
 0xec8   :  { %v1451_v45 = vadd.f32 1.0, %v2573_v44 }
 0xeca   :  { %2574 = vrcp.f32 %v1451_v45 }
 0xed4   :  { %v2575_v46 = vpop.eup %2574 }
 0xed5   :  { %v1455_v49 = vmul.f32 %v2575_v46, %v1217_v23 }
 0xf38   :  { %v1458_v47 = vpop.permute.xlu1 %1457 }
 0xf39   :  { %v1460_v48 = vmul.f32 %v2575_v46, %v1458_v47 }
 0xf3b   :  { %1462 = vrot.lane.b32.xlu0 %v1460_v48, %s2604_s10 }
 0xfad   :  { %v1463_v50 = vpop.permute.xlu0 %1462 }
 0xfae   :  { %v1465_v51 = vadd.f32 %v1463_v50, %v1455_v49 }
 0xfb0   :  { %2576 = vtanh.f32 %v1465_v51 }
 0xfba   :  { %v2577_v52 = vpop.eup %2576 }
 0xfbb   :  { %1468 = vrot.lane.b32.xlu1 %v2577_v52, %s2603_s9 }
0x102d   :  { %v1469_v53 = vpop.permute.xlu1 %1468 }
0x102e   :  { %v1471_v54 = vmul.f32 %v2575_v46, %v1469_v53 }
0x1030   :  { %1473 = vrot.lane.b32.xlu0 %v1471_v54, %s2604_s10 }
0x10a2   :  { %v1474_v55 = vpop.permute.xlu0 %1473 }
0x10a3   :  { %2362 = vmatmul.mubr.msk.f32.vlgmr.msra.gmra.mrb[16].mxu1 %vm56_vm2, %v1474_v55  ;;  %2373 = vmatmul.mubr.msk.f32.vlgmr.msra.gmra.mrb[18].mxu0 %vm56_vm2, %v1474_v55 }
0x10a4   :  { %2376 = vmatpush3.msra.mxu1 %v2674_v9  ;;  %2377 = vmatprep.mubr.msk.f32.mxu1 %vm2601_vm1, %v2602_v4 }
0x10a5   :  { %2502 = vmatprep.subr.bf16.mxu1 %v2600_v0  ;;  %2498 = vmatpush3.bf16.msra.mxu0 %v2712_v33 }
0x10a6   :  { %2499 = vmatprep.subr.bf16.mxu0 %v2600_v0  ;;  %2388 = vmatprep.mubr.msk.f32.mxu0 %vm2601_vm1, %v2602_v4 }
0x10a7   :  { %2378 = vmatmul.mubr.msk.f32.vlgmr.msra.gmra.mrb[18].mxu1 %vm130_vm3, %v2094_v56 }
0x10a8   :  { %2504 = vmatpush3.bf16.msra.mxu1 %v2657_v5  ;;  %2399 = vmatprep.mubr.msk.f32.mxu1 %vm2601_vm1, %v2602_v4 }
0x10a9   :  { %2505 = vmatprep.subr.bf16.mxu1 %v2600_v0  ;;  %2501 = vmatpush3.bf16.msra.mxu0 %v2718_v35 }
0x10aa   :  { %2402 = vmatprep.subr.mxu0 %v2602_v4 }
0x10ac   :  { %2507 = vmatpush3.bf16.msra.mxu1 %v2666_v7 }
0x10ad   :  { %2508 = vmatprep.subr.bf16.mxu1 %v2600_v0 }
0x1176   :  { %v1543_v57 = vpop.f32.mrb[16].mxu1  ;;  %v1618_v58 = vpop.f32.mrb[18].mxu0 }
0x1177   :  { %v1544_v59 = vadd.f32 %v2750_v41, %v1543_v57  ;;  %v2363_v60 = vpop.f32.mrb[17].mxu1  ;;  %v2374_v61 = vpop.f32.mrb[19].mxu0 }
0x1179   :  { %2578 = vtanh.f32 %v1544_v59 }
0x117a   :  { %v1691_v5 = vpop.f32.mrb[18].mxu1 }
0x117b   :  { %v1692_v62 = vadd.f32 %v1691_v5, %v1618_v58  ;;  %v2379_v63 = vpop.f32.mrb[19].mxu1 }
0x117d   :  { %v1695_v1 = vadd.f32 %v2694_v13, %v1692_v62 }
0x117f   :  { %2580 = vtanh.f32 %v1695_v1  ;;  %v2097_v3 = vmul.f32 -1.442695, %v1695_v1 }
0x1181   :  { %2582 = vpow2.f32 %v2097_v3 }
0x1183   :  { %v2579_v2 = vpop.eup %2578 }
0x1184   :  { %2093 = vst [vmem:[%s2953_s6 + $0xa] sm:$0x3] %v2579_v2 }
0x1189   :  { %v2581_v7 = vpop.eup %2580 }
0x118a   :  { %1705 = vrot.lane.b32.xlu1 %v2581_v7, %s2603_s9 }
0x118b   :  { %v2583_v6 = vpop.eup %2582 }
0x118c   :  { %v1699_v8 = vadd.f32 1.0, %v2583_v6 }
0x118e   :  { %2584 = vrcp.f32 %v1699_v8 }
0x1198   :  { %v2585_v10 = vpop.eup %2584 }
0x1199   :  { %v1703_v14 = vmul.f32 %v2585_v10, %v1465_v51 }
0x11fc   :  { %v1706_v11 = vpop.permute.xlu1 %1705 }
0x11fd   :  { %v1708_v12 = vmul.f32 %v2585_v10, %v1706_v11 }
0x11ff   :  { %1710 = vrot.lane.b32.xlu0 %v1708_v12, %s2604_s10 }
0x1271   :  { %v1711_v15 = vpop.permute.xlu0 %1710 }
0x1272   :  { %v1713_v16 = vadd.f32 %v1711_v15, %v1703_v14 }
0x1274   :  { %2586 = vtanh.f32 %v1713_v16 }
0x127e   :  { %v2587_v17 = vpop.eup %2586 }
0x127f   :  { %1716 = vrot.lane.b32.xlu1 %v2587_v17, %s2603_s9 }
0x12f1   :  { %v1717_v18 = vpop.permute.xlu1 %1716 }
0x12f2   :  { %v1719_v19 = vmul.f32 %v2585_v10, %v1717_v18 }
0x12f4   :  { %1721 = vrot.lane.b32.xlu0 %v1719_v19, %s2604_s10 }
0x1366   :  { %v1722_v20 = vpop.permute.xlu0 %1721 }
0x1367   :  { %2389 = vmatmul.mubr.msk.f32.vlgmr.msra.gmra.mrb[20].mxu0 %vm56_vm2, %v1722_v20  ;;  %2400 = vmatmul.mubr.msk.f32.vlgmr.msra.gmra.mrb[20].mxu1 %vm56_vm2, %v1722_v20 }
0x1368   :  { %2403 = vmatpush3.msra.mxu0 %v2674_v9  ;;  %2404 = vmatprep.mubr.msk.f32.mxu0 %vm2601_vm1, %v2602_v4 }
0x1369   :  { %2510 = vmatpush3.bf16.msra.mxu1 %v2712_v33  ;;  %2415 = vmatprep.mubr.msk.f32.mxu1 %vm2601_vm1, %v2602_v4 }
0x136a   :  { %2511 = vmatprep.subr.bf16.mxu1 %v2600_v0 }
0x136b   :  { %2405 = vmatmul.mubr.msk.f32.vlgmr.msra.gmra.mrb[22].mxu0 %vm130_vm3, %v2100_v21 }
0x136d   :  { %2513 = vmatpush3.bf16.msra.mxu1 %v2718_v35 }
0x143a   :  { %v1791_v22 = vpop.f32.mrb[20].mxu0  ;;  %v1866_v9 = vpop.f32.mrb[20].mxu1 }
0x143b   :  { %v1792_v23 = vadd.f32 %v2750_v41, %v1791_v22  ;;  %v2390_v24 = vpop.f32.mrb[21].mxu0  ;;  %v2401_v25 = vpop.f32.mrb[21].mxu1 }
0x143d   :  { %2588 = vtanh.f32 %v1792_v23 }
0x143e   :  { %v1939_v26 = vpop.f32.mrb[22].mxu0 }
0x143f   :  { %v1940_v27 = vadd.f32 %v1939_v26, %v1866_v9  ;;  %v2406_v28 = vpop.f32.mrb[23].mxu0 }
0x1441   :  { %v1943_v33 = vadd.f32 %v2694_v13, %v1940_v27 }
0x1443   :  { %2590 = vtanh.f32 %v1943_v33  ;;  %v2103_v35 = vmul.f32 -1.442695, %v1943_v33 }
0x1445   :  { %2592 = vpow2.f32 %v2103_v35 }
0x1447   :  { %v2589_v4 = vpop.eup %2588 }
0x1448   :  { %2099 = vst [vmem:[%s2953_s6 + $0xc] sm:$0x3] %v2589_v4 }
0x144d   :  { %v2591_v0 = vpop.eup %2590 }
0x144e   :  { %1953 = vrot.lane.b32.xlu1 %v2591_v0, %s2603_s9 }
0x144f   :  { %v2593_v29 = vpop.eup %2592 }
0x1450   :  { %v1947_v30 = vadd.f32 1.0, %v2593_v29 }
0x1452   :  { %2594 = vrcp.f32 %v1947_v30 }
0x145c   :  { %v2595_v31 = vpop.eup %2594 }
0x145d   :  { %v1951_v13 = vmul.f32 %v2595_v31, %v1713_v16 }
0x14c0   :  { %v1954_v32 = vpop.permute.xlu1 %1953 }
0x14c1   :  { %v1956_v34 = vmul.f32 %v2595_v31, %v1954_v32 }
0x14c3   :  { %1958 = vrot.lane.b32.xlu0 %v1956_v34, %s2604_s10 }
0x1535   :  { %v1959_v36 = vpop.permute.xlu0 %1958 }
0x1536   :  { %v1961_v37 = vadd.f32 %v1959_v36, %v1951_v13 }
0x1538   :  { %2596 = vtanh.f32 %v1961_v37 }
0x1542   :  { %v2597_v38 = vpop.eup %2596 }
0x1543   :  { %1964 = vrot.lane.b32.xlu1 %v2597_v38, %s2603_s9 }
0x1547   :  { %2050 = vrot.lane.b32.xlu1 %v1961_v37, %s2605_s19 }
0x15b5   :  { %v1965_v39 = vpop.permute.xlu1 %1964 }
0x15b6   :  { %v1967_v40 = vmul.f32 %v2595_v31, %v1965_v39 }
0x15b8   :  { %1969 = vrot.lane.b32.xlu0 %v1967_v40, %s2604_s10 }
0x15b9   :  { %v2051_v42 = vpop.permute.xlu1 %2050 }
0x15ba   :  { %2053 = vst.msk [vmem:[#allocation3] sm:$0x3] %vm27_vm0, %v2051_v42 }
0x162a   :  { %v1970_v43 = vpop.permute.xlu0 %1969 }
0x162b   :  { %2048 = vst.msk [vmem:[#allocation2] sm:$0x3] %vm27_vm0, %v1970_v43  ;;  %2416 = vmatmul.mubr.msk.f32.vlgmr.msra.gmra.mrb[22].mxu1 %vm56_vm2, %v1970_v43 }
0x16fe   :  { %v2039_v44 = vpop.f32.mrb[22].mxu1 }
0x16ff   :  { %v2040_v45 = vadd.f32 %v2750_v41, %v2039_v44  ;;  %v2417_v46 = vpop.f32.mrb[23].mxu1 }
0x1701   :  { %2598 = vtanh.f32 %v2040_v45 }
0x170b   :  { %v2599_v47 = vpop.eup %2598 }
0x170c   :  { %2105 = vst [vmem:[%s2953_s6 + $0xe] sm:$0x3] %v2599_v47 }

</bundles_post_ra>
